<compile_context>
chip_gen: v6e
topology: v6e:2x2x1
jax: 0.10.0
libtpu: 0.0.40
codegen_flags: <defaults>
</compile_context>

<pallas_src>
import jax
import jax.numpy as jnp
from jax.experimental import pallas as pl
from jax.experimental.pallas import tpu as pltpu

_CHUNK = 8  # f32 sublane height: chunked waits/adds stay full-vreg aligned


def clip_text_embeddings_kernel(ids_ref, tok_hbm_ref, pos_ref, o_ref,
                                tok_vmem, copy_sems):
    # ids_ref    : SMEM scalar-prefetch ref, [B, S] int32 token ids.
    # tok_hbm_ref: raw HBM ref of the [V, D] token-embedding table (pl.ANY).
    # pos_ref    : (S, D) position-embedding rows, resident in VMEM.
    # o_ref      : (S, D) output slab for batch row b (leading dim squeezed).
    # tok_vmem   : (S, D) VMEM scratch receiving the gathered token rows.
    # copy_sems  : (S,) DMA semaphores, one per outstanding gather.
    b = pl.program_id(0)
    S, _ = o_ref.shape  # static at trace time

    # 1) Issue all S row-gather DMAs up front: maximum outstanding copies so
    #    HBM latency is hidden, overlapping the previous step's writeback DMA.
    for s in range(S):
        tok_id = ids_ref[b, s]
        pltpu.make_async_copy(
            tok_hbm_ref.at[pl.ds(tok_id, 1)],
            tok_vmem.at[pl.ds(s, 1)],
            copy_sems.at[s],
        ).start()

    # 2) Wait + add + store in sublane-aligned chunks of 8 rows: the VPU add
    #    and vreg stores for early rows proceed while later gathers are still
    #    in flight.
    for c0 in range(0, S, _CHUNK):
        ch = min(_CHUNK, S - c0)
        for s in range(c0, c0 + ch):
            pltpu.make_async_copy(
                tok_hbm_ref.at[pl.ds(0, 1)],   # dummy src; wait only needs sem+shape
                tok_vmem.at[pl.ds(s, 1)],
                copy_sems.at[s],
            ).wait()
        o_ref[pl.ds(c0, ch), :] = (tok_vmem[pl.ds(c0, ch), :]
                                   + pos_ref[pl.ds(c0, ch), :])


def clip_head_forward(input_ids, token_table, pos_table):
    """Pallas implementation of CLIPHead.forward (CLIP text embeddings)."""
    B, S = input_ids.shape
    V, D = token_table.shape
    P, _ = pos_table.shape
    assert S <= P, "sequence length exceeds max_position_embeddings"

    # Clamp untrusted ids so the manual gather DMA can never go out of bounds.
    ids = jnp.clip(input_ids.astype(jnp.int32), 0, V - 1)
    # position_ids = arange(S): only the first S rows are ever used.
    pos_used = pos_table[:S]

    grid_spec = pltpu.PrefetchScalarGridSpec(
        num_scalar_prefetch=1,          # ids land in SMEM, drive in-kernel gather
        grid=(B,),
        in_specs=[
            # token table stays in HBM; kernel gathers rows via manual DMA
            pl.BlockSpec(memory_space=pl.ANY),
            # position rows: constant block index -> DMA'd once, then resident
            pl.BlockSpec((S, D), lambda b, ids: (0, 0)),
        ],
        # (None, S, D): leading batch dim squeezed -> kernel sees a dense (S, D)
        # slab, full (8,128)-vreg stores and large writeback DMAs.
        out_specs=pl.BlockSpec((None, S, D), lambda b, ids: (b, 0, 0)),
        scratch_shapes=[
            pltpu.VMEM((S, D), token_table.dtype),
            pltpu.SemaphoreType.DMA((S,)),
        ],
    )

    return pl.pallas_call(
        clip_text_embeddings_kernel,
        out_shape=jax.ShapeDtypeStruct((B, S, D), token_table.dtype),
        grid_spec=grid_spec,
        compiler_params=pltpu.CompilerParams(
            dimension_semantics=("parallel",)),   # shards batch across TCs on v7x
    )(ids, token_table, pos_used)


if __name__ == "__main__":
    # Small, deterministic synthetic CLIP text-embedding parameters.
    B, S = 2, 8          # batch, sequence length
    D = 128              # hidden size (lane-dense)
    V = 64               # vocab size
    P = 16               # max_position_embeddings

    key = jax.random.PRNGKey(0)
    k_tok, k_pos, k_ids = jax.random.split(key, 3)
    token_table = jax.random.normal(k_tok, (V, D), jnp.float32) * 0.02
    pos_table = jax.random.normal(k_pos, (P, D), jnp.float32) * 0.02
    input_ids = jax.random.randint(k_ids, (B, S), 0, V, dtype=jnp.int32)

    out = clip_head_forward(input_ids, token_table, pos_table)
    out = jax.block_until_ready(out)

    # Reference: token_embedding(ids) + position_embedding(arange(S))
    ref = token_table[input_ids] + pos_table[:S][None, :, :]
    assert out.shape == (B, S, D)
    assert out.dtype == jnp.float32
    assert jnp.allclose(out, ref, atol=1e-6)

    print("KERNEL_OK")
</pallas_src>

<mosaic_0001>
module attributes {stable_mosaic.version = 11 : i64} {
  func.func @clip_text_embeddings_kernel(%arg0: i32, %arg1: memref<2x8xi32, #tpu.memory_space<smem>>, %arg2: memref<64x128xf32, #tpu.memory_space<any>>, %arg3: memref<8x128xf32, #tpu.memory_space<vmem>>, %arg4: memref<1x8x128xf32, #tpu.memory_space<vmem>>, %arg5: memref<8x128xf32, #tpu.memory_space<vmem>>, %arg6: memref<8x!tpu.dma_semaphore, #tpu.memory_space<semaphore_mem>>) attributes {dimension_semantics = [#tpu.dimension_semantics<parallel>], iteration_bounds = array<i64: 2>, scalar_prefetch = 1 : i64, scratch_operands = 2 : i64, tpu.core_type = #tpu.core_type<tc>, window_params = [{}, {pipeline_mode = #tpu.pipeline_mode<synchronous>, transform_indices = @transform_1, window_bounds = array<i64: 8, 128>}, {transform_indices = @transform_2, window_bounds = array<i64: 1, 8, 128>}]} {
    %0 = arith.index_cast %arg0 : i32 to index
    %c0 = arith.constant 0 : index
    %1 = memref.load %arg1[%0, %c0] : memref<2x8xi32, #tpu.memory_space<smem>>
    %c0_i32 = arith.constant 0 : i32
    %c0_i32_0 = arith.constant 0 : i32
    %2 = tpu.memref_slice %arg2[%1, %c0_i32_0] : memref<64x128xf32, #tpu.memory_space<any>> -> memref<1x128xf32, #tpu.memory_space<any>>
    %c0_i32_1 = arith.constant 0 : i32
    %c0_i32_2 = arith.constant 0 : i32
    %3 = tpu.memref_slice %arg5[%c0_i32_1, %c0_i32_2] : memref<8x128xf32, #tpu.memory_space<vmem>> -> memref<1x128xf32, #tpu.memory_space<vmem>>
    %4 = tpu.memref_slice %arg6[%c0_i32] : memref<8x!tpu.dma_semaphore, #tpu.memory_space<semaphore_mem>> -> memref<1x!tpu.dma_semaphore, #tpu.memory_space<semaphore_mem>>
    %5 = tpu.memref_squeeze %4 : memref<1x!tpu.dma_semaphore, #tpu.memory_space<semaphore_mem>> -> memref<!tpu.dma_semaphore, #tpu.memory_space<semaphore_mem>>
    tpu.enqueue_dma source(%2 : memref<1x128xf32, #tpu.memory_space<any>>) target(%3 : memref<1x128xf32, #tpu.memory_space<vmem>>) target_semaphore(%5 : memref<!tpu.dma_semaphore, #tpu.memory_space<semaphore_mem>>)
    %6 = arith.index_cast %arg0 : i32 to index
    %c1 = arith.constant 1 : index
    %7 = memref.load %arg1[%6, %c1] : memref<2x8xi32, #tpu.memory_space<smem>>
    %c1_i32 = arith.constant 1 : i32
    %c0_i32_3 = arith.constant 0 : i32
    %8 = tpu.memref_slice %arg2[%7, %c0_i32_3] : memref<64x128xf32, #tpu.memory_space<any>> -> memref<1x128xf32, #tpu.memory_space<any>>
    %c1_i32_4 = arith.constant 1 : i32
    %c0_i32_5 = arith.constant 0 : i32
    %9 = tpu.memref_slice %arg5[%c1_i32_4, %c0_i32_5] : memref<8x128xf32, #tpu.memory_space<vmem>> -> memref<1x128xf32, #tpu.memory_space<vmem>>
    %10 = tpu.memref_slice %arg6[%c1_i32] : memref<8x!tpu.dma_semaphore, #tpu.memory_space<semaphore_mem>> -> memref<1x!tpu.dma_semaphore, #tpu.memory_space<semaphore_mem>>
    %11 = tpu.memref_squeeze %10 : memref<1x!tpu.dma_semaphore, #tpu.memory_space<semaphore_mem>> -> memref<!tpu.dma_semaphore, #tpu.memory_space<semaphore_mem>>
    tpu.enqueue_dma source(%8 : memref<1x128xf32, #tpu.memory_space<any>>) target(%9 : memref<1x128xf32, #tpu.memory_space<vmem>>) target_semaphore(%11 : memref<!tpu.dma_semaphore, #tpu.memory_space<semaphore_mem>>)
    %12 = arith.index_cast %arg0 : i32 to index
    %c2 = arith.constant 2 : index
    %13 = memref.load %arg1[%12, %c2] : memref<2x8xi32, #tpu.memory_space<smem>>
    %c2_i32 = arith.constant 2 : i32
    %c0_i32_6 = arith.constant 0 : i32
    %14 = tpu.memref_slice %arg2[%13, %c0_i32_6] : memref<64x128xf32, #tpu.memory_space<any>> -> memref<1x128xf32, #tpu.memory_space<any>>
    %c2_i32_7 = arith.constant 2 : i32
    %c0_i32_8 = arith.constant 0 : i32
    %15 = tpu.memref_slice %arg5[%c2_i32_7, %c0_i32_8] : memref<8x128xf32, #tpu.memory_space<vmem>> -> memref<1x128xf32, #tpu.memory_space<vmem>>
    %16 = tpu.memref_slice %arg6[%c2_i32] : memref<8x!tpu.dma_semaphore, #tpu.memory_space<semaphore_mem>> -> memref<1x!tpu.dma_semaphore, #tpu.memory_space<semaphore_mem>>
    %17 = tpu.memref_squeeze %16 : memref<1x!tpu.dma_semaphore, #tpu.memory_space<semaphore_mem>> -> memref<!tpu.dma_semaphore, #tpu.memory_space<semaphore_mem>>
    tpu.enqueue_dma source(%14 : memref<1x128xf32, #tpu.memory_space<any>>) target(%15 : memref<1x128xf32, #tpu.memory_space<vmem>>) target_semaphore(%17 : memref<!tpu.dma_semaphore, #tpu.memory_space<semaphore_mem>>)
    %18 = arith.index_cast %arg0 : i32 to index
    %c3 = arith.constant 3 : index
    %19 = memref.load %arg1[%18, %c3] : memref<2x8xi32, #tpu.memory_space<smem>>
    %c3_i32 = arith.constant 3 : i32
    %c0_i32_9 = arith.constant 0 : i32
    %20 = tpu.memref_slice %arg2[%19, %c0_i32_9] : memref<64x128xf32, #tpu.memory_space<any>> -> memref<1x128xf32, #tpu.memory_space<any>>
    %c3_i32_10 = arith.constant 3 : i32
    %c0_i32_11 = arith.constant 0 : i32
    %21 = tpu.memref_slice %arg5[%c3_i32_10, %c0_i32_11] : memref<8x128xf32, #tpu.memory_space<vmem>> -> memref<1x128xf32, #tpu.memory_space<vmem>>
    %22 = tpu.memref_slice %arg6[%c3_i32] : memref<8x!tpu.dma_semaphore, #tpu.memory_space<semaphore_mem>> -> memref<1x!tpu.dma_semaphore, #tpu.memory_space<semaphore_mem>>
    %23 = tpu.memref_squeeze %22 : memref<1x!tpu.dma_semaphore, #tpu.memory_space<semaphore_mem>> -> memref<!tpu.dma_semaphore, #tpu.memory_space<semaphore_mem>>
    tpu.enqueue_dma source(%20 : memref<1x128xf32, #tpu.memory_space<any>>) target(%21 : memref<1x128xf32, #tpu.memory_space<vmem>>) target_semaphore(%23 : memref<!tpu.dma_semaphore, #tpu.memory_space<semaphore_mem>>)
    %24 = arith.index_cast %arg0 : i32 to index
    %c4 = arith.constant 4 : index
    %25 = memref.load %arg1[%24, %c4] : memref<2x8xi32, #tpu.memory_space<smem>>
    %c4_i32 = arith.constant 4 : i32
    %c0_i32_12 = arith.constant 0 : i32
    %26 = tpu.memref_slice %arg2[%25, %c0_i32_12] : memref<64x128xf32, #tpu.memory_space<any>> -> memref<1x128xf32, #tpu.memory_space<any>>
    %c4_i32_13 = arith.constant 4 : i32
    %c0_i32_14 = arith.constant 0 : i32
    %27 = tpu.memref_slice %arg5[%c4_i32_13, %c0_i32_14] : memref<8x128xf32, #tpu.memory_space<vmem>> -> memref<1x128xf32, #tpu.memory_space<vmem>>
    %28 = tpu.memref_slice %arg6[%c4_i32] : memref<8x!tpu.dma_semaphore, #tpu.memory_space<semaphore_mem>> -> memref<1x!tpu.dma_semaphore, #tpu.memory_space<semaphore_mem>>
    %29 = tpu.memref_squeeze %28 : memref<1x!tpu.dma_semaphore, #tpu.memory_space<semaphore_mem>> -> memref<!tpu.dma_semaphore, #tpu.memory_space<semaphore_mem>>
    tpu.enqueue_dma source(%26 : memref<1x128xf32, #tpu.memory_space<any>>) target(%27 : memref<1x128xf32, #tpu.memory_space<vmem>>) target_semaphore(%29 : memref<!tpu.dma_semaphore, #tpu.memory_space<semaphore_mem>>)
    %30 = arith.index_cast %arg0 : i32 to index
    %c5 = arith.constant 5 : index
    %31 = memref.load %arg1[%30, %c5] : memref<2x8xi32, #tpu.memory_space<smem>>
    %c5_i32 = arith.constant 5 : i32
    %c0_i32_15 = arith.constant 0 : i32
    %32 = tpu.memref_slice %arg2[%31, %c0_i32_15] : memref<64x128xf32, #tpu.memory_space<any>> -> memref<1x128xf32, #tpu.memory_space<any>>
    %c5_i32_16 = arith.constant 5 : i32
    %c0_i32_17 = arith.constant 0 : i32
    %33 = tpu.memref_slice %arg5[%c5_i32_16, %c0_i32_17] : memref<8x128xf32, #tpu.memory_space<vmem>> -> memref<1x128xf32, #tpu.memory_space<vmem>>
    %34 = tpu.memref_slice %arg6[%c5_i32] : memref<8x!tpu.dma_semaphore, #tpu.memory_space<semaphore_mem>> -> memref<1x!tpu.dma_semaphore, #tpu.memory_space<semaphore_mem>>
    %35 = tpu.memref_squeeze %34 : memref<1x!tpu.dma_semaphore, #tpu.memory_space<semaphore_mem>> -> memref<!tpu.dma_semaphore, #tpu.memory_space<semaphore_mem>>
    tpu.enqueue_dma source(%32 : memref<1x128xf32, #tpu.memory_space<any>>) target(%33 : memref<1x128xf32, #tpu.memory_space<vmem>>) target_semaphore(%35 : memref<!tpu.dma_semaphore, #tpu.memory_space<semaphore_mem>>)
    %36 = arith.index_cast %arg0 : i32 to index
    %c6 = arith.constant 6 : index
    %37 = memref.load %arg1[%36, %c6] : memref<2x8xi32, #tpu.memory_space<smem>>
    %c6_i32 = arith.constant 6 : i32
    %c0_i32_18 = arith.constant 0 : i32
    %38 = tpu.memref_slice %arg2[%37, %c0_i32_18] : memref<64x128xf32, #tpu.memory_space<any>> -> memref<1x128xf32, #tpu.memory_space<any>>
    %c6_i32_19 = arith.constant 6 : i32
    %c0_i32_20 = arith.constant 0 : i32
    %39 = tpu.memref_slice %arg5[%c6_i32_19, %c0_i32_20] : memref<8x128xf32, #tpu.memory_space<vmem>> -> memref<1x128xf32, #tpu.memory_space<vmem>>
    %40 = tpu.memref_slice %arg6[%c6_i32] : memref<8x!tpu.dma_semaphore, #tpu.memory_space<semaphore_mem>> -> memref<1x!tpu.dma_semaphore, #tpu.memory_space<semaphore_mem>>
    %41 = tpu.memref_squeeze %40 : memref<1x!tpu.dma_semaphore, #tpu.memory_space<semaphore_mem>> -> memref<!tpu.dma_semaphore, #tpu.memory_space<semaphore_mem>>
    tpu.enqueue_dma source(%38 : memref<1x128xf32, #tpu.memory_space<any>>) target(%39 : memref<1x128xf32, #tpu.memory_space<vmem>>) target_semaphore(%41 : memref<!tpu.dma_semaphore, #tpu.memory_space<semaphore_mem>>)
    %42 = arith.index_cast %arg0 : i32 to index
    %c7 = arith.constant 7 : index
    %43 = memref.load %arg1[%42, %c7] : memref<2x8xi32, #tpu.memory_space<smem>>
    %c7_i32 = arith.constant 7 : i32
    %c0_i32_21 = arith.constant 0 : i32
    %44 = tpu.memref_slice %arg2[%43, %c0_i32_21] : memref<64x128xf32, #tpu.memory_space<any>> -> memref<1x128xf32, #tpu.memory_space<any>>
    %c7_i32_22 = arith.constant 7 : i32
    %c0_i32_23 = arith.constant 0 : i32
    %45 = tpu.memref_slice %arg5[%c7_i32_22, %c0_i32_23] : memref<8x128xf32, #tpu.memory_space<vmem>> -> memref<1x128xf32, #tpu.memory_space<vmem>>
    %46 = tpu.memref_slice %arg6[%c7_i32] : memref<8x!tpu.dma_semaphore, #tpu.memory_space<semaphore_mem>> -> memref<1x!tpu.dma_semaphore, #tpu.memory_space<semaphore_mem>>
    %47 = tpu.memref_squeeze %46 : memref<1x!tpu.dma_semaphore, #tpu.memory_space<semaphore_mem>> -> memref<!tpu.dma_semaphore, #tpu.memory_space<semaphore_mem>>
    tpu.enqueue_dma source(%44 : memref<1x128xf32, #tpu.memory_space<any>>) target(%45 : memref<1x128xf32, #tpu.memory_space<vmem>>) target_semaphore(%47 : memref<!tpu.dma_semaphore, #tpu.memory_space<semaphore_mem>>)
    %c0_i32_24 = arith.constant 0 : i32
    %c0_i32_25 = arith.constant 0 : i32
    %c0_i32_26 = arith.constant 0 : i32
    %48 = tpu.memref_slice %arg2[%c0_i32_25, %c0_i32_26] : memref<64x128xf32, #tpu.memory_space<any>> -> memref<1x128xf32, #tpu.memory_space<any>>
    %c0_i32_27 = arith.constant 0 : i32
    %c0_i32_28 = arith.constant 0 : i32
    %49 = tpu.memref_slice %arg5[%c0_i32_27, %c0_i32_28] : memref<8x128xf32, #tpu.memory_space<vmem>> -> memref<1x128xf32, #tpu.memory_space<vmem>>
    %50 = tpu.memref_slice %arg6[%c0_i32_24] : memref<8x!tpu.dma_semaphore, #tpu.memory_space<semaphore_mem>> -> memref<1x!tpu.dma_semaphore, #tpu.memory_space<semaphore_mem>>
    %51 = tpu.memref_squeeze %50 : memref<1x!tpu.dma_semaphore, #tpu.memory_space<semaphore_mem>> -> memref<!tpu.dma_semaphore, #tpu.memory_space<semaphore_mem>>
    tpu.wait_dma2 semaphore(%51 : memref<!tpu.dma_semaphore, #tpu.memory_space<semaphore_mem>>) src(%48 : memref<1x128xf32, #tpu.memory_space<any>>) dst(%49 : memref<1x128xf32, #tpu.memory_space<vmem>>)
    %c1_i32_29 = arith.constant 1 : i32
    %c0_i32_30 = arith.constant 0 : i32
    %c0_i32_31 = arith.constant 0 : i32
    %52 = tpu.memref_slice %arg2[%c0_i32_30, %c0_i32_31] : memref<64x128xf32, #tpu.memory_space<any>> -> memref<1x128xf32, #tpu.memory_space<any>>
    %c1_i32_32 = arith.constant 1 : i32
    %c0_i32_33 = arith.constant 0 : i32
    %53 = tpu.memref_slice %arg5[%c1_i32_32, %c0_i32_33] : memref<8x128xf32, #tpu.memory_space<vmem>> -> memref<1x128xf32, #tpu.memory_space<vmem>>
    %54 = tpu.memref_slice %arg6[%c1_i32_29] : memref<8x!tpu.dma_semaphore, #tpu.memory_space<semaphore_mem>> -> memref<1x!tpu.dma_semaphore, #tpu.memory_space<semaphore_mem>>
    %55 = tpu.memref_squeeze %54 : memref<1x!tpu.dma_semaphore, #tpu.memory_space<semaphore_mem>> -> memref<!tpu.dma_semaphore, #tpu.memory_space<semaphore_mem>>
    tpu.wait_dma2 semaphore(%55 : memref<!tpu.dma_semaphore, #tpu.memory_space<semaphore_mem>>) src(%52 : memref<1x128xf32, #tpu.memory_space<any>>) dst(%53 : memref<1x128xf32, #tpu.memory_space<vmem>>)
    %c2_i32_34 = arith.constant 2 : i32
    %c0_i32_35 = arith.constant 0 : i32
    %c0_i32_36 = arith.constant 0 : i32
    %56 = tpu.memref_slice %arg2[%c0_i32_35, %c0_i32_36] : memref<64x128xf32, #tpu.memory_space<any>> -> memref<1x128xf32, #tpu.memory_space<any>>
    %c2_i32_37 = arith.constant 2 : i32
    %c0_i32_38 = arith.constant 0 : i32
    %57 = tpu.memref_slice %arg5[%c2_i32_37, %c0_i32_38] : memref<8x128xf32, #tpu.memory_space<vmem>> -> memref<1x128xf32, #tpu.memory_space<vmem>>
    %58 = tpu.memref_slice %arg6[%c2_i32_34] : memref<8x!tpu.dma_semaphore, #tpu.memory_space<semaphore_mem>> -> memref<1x!tpu.dma_semaphore, #tpu.memory_space<semaphore_mem>>
    %59 = tpu.memref_squeeze %58 : memref<1x!tpu.dma_semaphore, #tpu.memory_space<semaphore_mem>> -> memref<!tpu.dma_semaphore, #tpu.memory_space<semaphore_mem>>
    tpu.wait_dma2 semaphore(%59 : memref<!tpu.dma_semaphore, #tpu.memory_space<semaphore_mem>>) src(%56 : memref<1x128xf32, #tpu.memory_space<any>>) dst(%57 : memref<1x128xf32, #tpu.memory_space<vmem>>)
    %c3_i32_39 = arith.constant 3 : i32
    %c0_i32_40 = arith.constant 0 : i32
    %c0_i32_41 = arith.constant 0 : i32
    %60 = tpu.memref_slice %arg2[%c0_i32_40, %c0_i32_41] : memref<64x128xf32, #tpu.memory_space<any>> -> memref<1x128xf32, #tpu.memory_space<any>>
    %c3_i32_42 = arith.constant 3 : i32
    %c0_i32_43 = arith.constant 0 : i32
    %61 = tpu.memref_slice %arg5[%c3_i32_42, %c0_i32_43] : memref<8x128xf32, #tpu.memory_space<vmem>> -> memref<1x128xf32, #tpu.memory_space<vmem>>
    %62 = tpu.memref_slice %arg6[%c3_i32_39] : memref<8x!tpu.dma_semaphore, #tpu.memory_space<semaphore_mem>> -> memref<1x!tpu.dma_semaphore, #tpu.memory_space<semaphore_mem>>
    %63 = tpu.memref_squeeze %62 : memref<1x!tpu.dma_semaphore, #tpu.memory_space<semaphore_mem>> -> memref<!tpu.dma_semaphore, #tpu.memory_space<semaphore_mem>>
    tpu.wait_dma2 semaphore(%63 : memref<!tpu.dma_semaphore, #tpu.memory_space<semaphore_mem>>) src(%60 : memref<1x128xf32, #tpu.memory_space<any>>) dst(%61 : memref<1x128xf32, #tpu.memory_space<vmem>>)
    %c4_i32_44 = arith.constant 4 : i32
    %c0_i32_45 = arith.constant 0 : i32
    %c0_i32_46 = arith.constant 0 : i32
    %64 = tpu.memref_slice %arg2[%c0_i32_45, %c0_i32_46] : memref<64x128xf32, #tpu.memory_space<any>> -> memref<1x128xf32, #tpu.memory_space<any>>
    %c4_i32_47 = arith.constant 4 : i32
    %c0_i32_48 = arith.constant 0 : i32
    %65 = tpu.memref_slice %arg5[%c4_i32_47, %c0_i32_48] : memref<8x128xf32, #tpu.memory_space<vmem>> -> memref<1x128xf32, #tpu.memory_space<vmem>>
    %66 = tpu.memref_slice %arg6[%c4_i32_44] : memref<8x!tpu.dma_semaphore, #tpu.memory_space<semaphore_mem>> -> memref<1x!tpu.dma_semaphore, #tpu.memory_space<semaphore_mem>>
    %67 = tpu.memref_squeeze %66 : memref<1x!tpu.dma_semaphore, #tpu.memory_space<semaphore_mem>> -> memref<!tpu.dma_semaphore, #tpu.memory_space<semaphore_mem>>
    tpu.wait_dma2 semaphore(%67 : memref<!tpu.dma_semaphore, #tpu.memory_space<semaphore_mem>>) src(%64 : memref<1x128xf32, #tpu.memory_space<any>>) dst(%65 : memref<1x128xf32, #tpu.memory_space<vmem>>)
    %c5_i32_49 = arith.constant 5 : i32
    %c0_i32_50 = arith.constant 0 : i32
    %c0_i32_51 = arith.constant 0 : i32
    %68 = tpu.memref_slice %arg2[%c0_i32_50, %c0_i32_51] : memref<64x128xf32, #tpu.memory_space<any>> -> memref<1x128xf32, #tpu.memory_space<any>>
    %c5_i32_52 = arith.constant 5 : i32
    %c0_i32_53 = arith.constant 0 : i32
    %69 = tpu.memref_slice %arg5[%c5_i32_52, %c0_i32_53] : memref<8x128xf32, #tpu.memory_space<vmem>> -> memref<1x128xf32, #tpu.memory_space<vmem>>
    %70 = tpu.memref_slice %arg6[%c5_i32_49] : memref<8x!tpu.dma_semaphore, #tpu.memory_space<semaphore_mem>> -> memref<1x!tpu.dma_semaphore, #tpu.memory_space<semaphore_mem>>
    %71 = tpu.memref_squeeze %70 : memref<1x!tpu.dma_semaphore, #tpu.memory_space<semaphore_mem>> -> memref<!tpu.dma_semaphore, #tpu.memory_space<semaphore_mem>>
    tpu.wait_dma2 semaphore(%71 : memref<!tpu.dma_semaphore, #tpu.memory_space<semaphore_mem>>) src(%68 : memref<1x128xf32, #tpu.memory_space<any>>) dst(%69 : memref<1x128xf32, #tpu.memory_space<vmem>>)
    %c6_i32_54 = arith.constant 6 : i32
    %c0_i32_55 = arith.constant 0 : i32
    %c0_i32_56 = arith.constant 0 : i32
    %72 = tpu.memref_slice %arg2[%c0_i32_55, %c0_i32_56] : memref<64x128xf32, #tpu.memory_space<any>> -> memref<1x128xf32, #tpu.memory_space<any>>
    %c6_i32_57 = arith.constant 6 : i32
    %c0_i32_58 = arith.constant 0 : i32
    %73 = tpu.memref_slice %arg5[%c6_i32_57, %c0_i32_58] : memref<8x128xf32, #tpu.memory_space<vmem>> -> memref<1x128xf32, #tpu.memory_space<vmem>>
    %74 = tpu.memref_slice %arg6[%c6_i32_54] : memref<8x!tpu.dma_semaphore, #tpu.memory_space<semaphore_mem>> -> memref<1x!tpu.dma_semaphore, #tpu.memory_space<semaphore_mem>>
    %75 = tpu.memref_squeeze %74 : memref<1x!tpu.dma_semaphore, #tpu.memory_space<semaphore_mem>> -> memref<!tpu.dma_semaphore, #tpu.memory_space<semaphore_mem>>
    tpu.wait_dma2 semaphore(%75 : memref<!tpu.dma_semaphore, #tpu.memory_space<semaphore_mem>>) src(%72 : memref<1x128xf32, #tpu.memory_space<any>>) dst(%73 : memref<1x128xf32, #tpu.memory_space<vmem>>)
    %c7_i32_59 = arith.constant 7 : i32
    %c0_i32_60 = arith.constant 0 : i32
    %c0_i32_61 = arith.constant 0 : i32
    %76 = tpu.memref_slice %arg2[%c0_i32_60, %c0_i32_61] : memref<64x128xf32, #tpu.memory_space<any>> -> memref<1x128xf32, #tpu.memory_space<any>>
    %c7_i32_62 = arith.constant 7 : i32
    %c0_i32_63 = arith.constant 0 : i32
    %77 = tpu.memref_slice %arg5[%c7_i32_62, %c0_i32_63] : memref<8x128xf32, #tpu.memory_space<vmem>> -> memref<1x128xf32, #tpu.memory_space<vmem>>
    %78 = tpu.memref_slice %arg6[%c7_i32_59] : memref<8x!tpu.dma_semaphore, #tpu.memory_space<semaphore_mem>> -> memref<1x!tpu.dma_semaphore, #tpu.memory_space<semaphore_mem>>
    %79 = tpu.memref_squeeze %78 : memref<1x!tpu.dma_semaphore, #tpu.memory_space<semaphore_mem>> -> memref<!tpu.dma_semaphore, #tpu.memory_space<semaphore_mem>>
    tpu.wait_dma2 semaphore(%79 : memref<!tpu.dma_semaphore, #tpu.memory_space<semaphore_mem>>) src(%76 : memref<1x128xf32, #tpu.memory_space<any>>) dst(%77 : memref<1x128xf32, #tpu.memory_space<vmem>>)
    %c0_64 = arith.constant 0 : index
    %c0_65 = arith.constant 0 : index
    %80 = vector.load %arg5[%c0_64, %c0_65] : memref<8x128xf32, #tpu.memory_space<vmem>>, vector<8x128xf32>
    %c0_66 = arith.constant 0 : index
    %c0_67 = arith.constant 0 : index
    %81 = vector.load %arg3[%c0_66, %c0_67] : memref<8x128xf32, #tpu.memory_space<vmem>>, vector<8x128xf32>
    %82 = arith.addf %80, %81 : vector<8x128xf32>
    %c0_68 = arith.constant 0 : index
    %c0_69 = arith.constant 0 : index
    %c0_70 = arith.constant 0 : index
    %83 = vector.load %arg4[%c0_68, %c0_69, %c0_70] : memref<1x8x128xf32, #tpu.memory_space<vmem>>, vector<1x8x128xf32>
    %84 = vector.shape_cast %83 : vector<1x8x128xf32> to vector<8x128xf32>
    %85 = vector.shape_cast %82 : vector<8x128xf32> to vector<1x8x128xf32>
    tpu.vector_store %arg4[%c0_68, %c0_69, %c0_70], %85 {strides = array<i32>} : memref<1x8x128xf32, #tpu.memory_space<vmem>>, vector<1x8x128xf32>,
    return
  }
  func.func @transform_1(%arg0: i32, %arg1: memref<2x8xi32, #tpu.memory_space<smem>>) -> (i32, i32) {
    %c0_i32 = arith.constant 0 : i32
    %c0_i32_0 = arith.constant 0 : i32
    %c0_i32_1 = arith.constant 0 : i32
    return %c0_i32, %c0_i32_0 : i32, i32
  }
  func.func @transform_2(%arg0: i32, %arg1: memref<2x8xi32, #tpu.memory_space<smem>>) -> (i32, i32, i32) {
    %c0_i32 = arith.constant 0 : i32
    %c0_i32_0 = arith.constant 0 : i32
    %c0_i32_1 = arith.constant 0 : i32
    return %arg0, %c0_i32, %c0_i32_0 : i32, i32, i32
  }
}

</mosaic_0001>

<bundles_post_ra>
// kernel: tpu_custom_call.1
= control target key start
LH: loop header
LB: loop body
LE: loop exit
PB: predicated region body
PF: predicated region fallthrough
CT: control target
= control target key end

     0   :  { %s793_s12 = smov [#allocation5]   ;;  %s1058_s0 = inlined_call_operand.hbm [shape: s32[2,8], index: 0, kind: input, shape index: {}]   ;;  %s1059_s1 = inlined_call_operand.hbm [shape: f32[64,128], index: 1, kind: input, shape index: {}]   ;;  %s1060_s2 = inlined_call_operand.hbm [shape: f32[8,128], index: 2, kind: input, shape index: {}]   ;;  %s1061_s3 = inlined_call_operand.hbm [shape: f32[2,8,128], index: 3, kind: output, shape index: {}]  }
   0x1   :  { %1063 = sst [smem:[#allocation39_spill]] %s1060_s2 }
   0x2   :  { %9 = dma.hbm_to_smem %s1058_s0, 32, %s793_s12, [#allocation4] }
   0x3   :  { %751 = dma.done.wait [#allocation4], 32 }
   0x4   :  { %752 = vsyncadd [#allocation4], 4294967264 }
   0x5   :  { %11 = sfence }
   0x6   :  { %12 = vsyncpa [#allocation7], 0 }
   0x7   :  { %13 = vsyncpa [#allocation8], 0 }
   0x8   :  { %15 = vsyncpa [#allocation8 + $0x1], 0  ;;  %s827_s15 = smov 0   ;;  %s829_s16 = smov 0  }
   0x9   :  { %s831_s17 = smov 0   ;;  %s833_s18 = smov 0  }
   0xa LB: > { %s848_s0 = sadd.s32 4294967295, %s791_s18   ;;  %s413_s19 = sadd.s32 4294967294, %s791_s18   ;;  %s791_s18 = sphi %s833_s18, %s1073_s18   ;;  %s787_s17 = sphi %s831_s17, %s1072_s17   ;;  %s783_s16 = sphi %s829_s16, %s1071_s16   ;;  %s779_s15 = sphi %s827_s15, %s1070_s15  }
   0xb   : > { %s852_s20 = sadd.s32 1, %s791_s18   ;;  %s49_s21 = sadd.s32 1, %s787_s17 }
   0xc   : > { %s46_s22 = ssub.s32 %s791_s18, %s852_s20  ;;  %p59_p0 = scmp.ne.s32.totalorder %s787_s17, %s783_s16 }
   0xd   : > { %p47_p1 = scmp.eq.s32.totalorder %s46_s22, 0  ;;  %p60_p2 = scmp.eq.s32.totalorder %s848_s0, 1 }
   0xe   : > { %p65_p3 = scmp.ne.s32.totalorder %s783_s16, %s779_s15  ;;  %p66_p4 = scmp.eq.s32.totalorder %s413_s19, 1 }
   0xf   : > { %s863_s23 = scalar_select %p47_p1, %s787_s17, %s49_s21  }
  0x10   : > { %p865_p5 = por %p60_p2, %p59_p0  ;;  %p869_p6 = por %p66_p4, %p65_p3 }
  0x11   : > { %p414_p7 = scmp.ge.s32.totalorder %s791_s18, 1  ;;  %p73_p8 = scmp.lt.s32.totalorder %s791_s18, 3 }
  0x12   : > { %s1065_s25 = scalar_select %p869_p6, 1, 0 }
  0x13   : > { %p454_p9 = scmp.eq.s32.totalorder %s848_s0, 0  ;;  %p876_p10 = pnand %p414_p7, %p73_p8 }
  0x14   : > { %s794_s27 = smov [#allocation6]  }
  0x15   : > { %s86_s28 = sshll.u32 %s794_s27, 4  ;;  %p446_p11 = pneg %p876_p10  ;;  %s87_s28 = int_to_ptr.vmem [resolvable:$true] %s86_s28 }
  0x16   : > { %s518_s29 = scalar_lea.vmem %s87_s28, 128  ;;  %p526_p3 = scmp.lt.s32.totalorder %s87_s28, %s87_s28 }
  0x17   : > { %p447_p12 = pnand %p454_p9, %p446_p11  ;;  %p519_p0 = scmp.ne.s32.totalorder %s87_s28, %s518_s29 }
  0x18   : > { %p527_p4 = scmp.lt.s32.totalorder %s518_s29, %s518_s29 }
  0x19   : > { %p509_p13 = pneg %p447_p12 }
  0x1a   : > { %p528_p6 = por %p527_p4, %p526_p3 }
  0x1b   : > { %p521_p1 = pnand %p519_p0, %p509_p13 }
  0x1d   : > { %p522_p2 = pneg %p521_p1 }
  0x1f   : > { %p529_p7 = pnand %p528_p6, %p522_p2 }
  0x21   : > { %532 = shalt.err (!%p529_p7)
}
  0x22   : > { %s1067_s2 = sld [smem:[#allocation39_spill]] }
  0x24   : > { %99 = sbr.rel (%p876_p10) target bundleno = 247 (0xf7), region = 24 }
  0x28   : > { %449 = dma.hbm_to_vmem [thread:$0]  (!%p447_p12), %s1067_s2, 128, %s87_s28, [#allocation7]  }
  0x29   : > { %754 = dma.done.wait (%p454_p9), [#allocation7], 128  }
  0x2a   : > { %756 = vsyncadd (%p454_p9), [#allocation7], 4294967168  ;;  %s1062_s5 = sand.u32 1, %s783_s16   ;;  %s895_s6 = sshll.u32 %s848_s0, 7 }
  0x2b   : > { %s899_s7 = sshll.u32 %s1062_s5, 3  ;;  %s115_s8 = sld [smem:[#allocation5 + %s895_s6]] }
  0x2c   : > { %s795_s9 = smov [#allocation2]   ;;  %s129_s11 = sadd.s32 1, %s895_s6 }
  0x2d   : > { %s125_s10 = sshll.u32 %s795_s9, 4  ;;  %s905_s12 = sld [smem:[#allocation5 + %s129_s11]]  ;;  %s903_s10 = int_to_ptr.vmem [resolvable:$true] %s125_s10 }
  0x2e   : > { %s146_s13 = sadd.s32 2, %s895_s6  ;;  %s796_s14 = smov [#allocation2 + $0x1]  }
  0x2f   : > { %s142_s19 = sshll.u32 %s796_s14, 4  ;;  %s908_s21 = sld [smem:[#allocation5 + %s146_s13]]  ;;  %s910_s19 = int_to_ptr.vmem [resolvable:$true] %s142_s19 }
  0x30   : > { %s918_s4 = scalar_lea.hbm %s1059_s1, 1024 }
  0x31   : > { %s420_s0 = sshll.u32 %s115_s8, 4 }
  0x32   : > { %s117_s27 = scalar_lea.hbm %s1059_s1, %s420_s0 }
  0x33   : > { %s533_s28 = scalar_lea.hbm %s117_s27, 16  ;;  %p536_p8 = scmp.lt.s32.totalorder %s117_s27, %s1059_s1 }
  0x34   : > { %p534_p6 = scmp.ne.s32.totalorder %s117_s27, %s533_s28  ;;  %p537_p9 = scmp.lt.s32.totalorder %s918_s4, %s533_s28 }
  0x36   : > { %p538_p10 = por %p537_p9, %p536_p8 }
  0x38   : > { %p539_p11 = pnand %p538_p10, %p534_p6 }
  0x3a   : > { %542 = shalt.err (!%p539_p11)  }
  0x3b   : > { %s543_s8 = scalar_lea.vmem %s903_s10, 16  ;;  %s927_s13 = scalar_lea.vmem %s903_s10, 128 }
  0x3c   : > { %p544_p12 = scmp.ne.s32.totalorder %s903_s10, %s543_s8  ;;  %p548_p13 = scmp.lt.s32.totalorder %s903_s10, %s903_s10 }
  0x3d   : > { %p549_p0 = scmp.lt.s32.totalorder %s927_s13, %s543_s8 }
  0x3f   : > { %p550_p1 = por %p549_p0, %p548_p13 }
  0x41   : > { %p551_p2 = pnand %p550_p1, %p544_p12 }
  0x43   : > { %554 = shalt.err (!%p551_p2)  }
  0x44   : > { %128 = dma.hbm_to_vmem [thread:$0]  %s117_s27, 16, %s903_s10, [#allocation3] }
  0x45   : > { %s421_s14 = sshll.u32 %s905_s12, 4  ;;  %s797_s0 = smov [#allocation2 + $0x2]  }
  0x46   : > { %s159_s22 = sshll.u32 %s797_s0, 4  ;;  %s132_s29 = scalar_lea.hbm %s1059_s1, %s421_s14  ;;  %s937_s22 = int_to_ptr.vmem [resolvable:$true] %s159_s22 }
  0x47   : > { %s555_s30 = scalar_lea.hbm %s132_s29, 16  ;;  %p558_p4 = scmp.lt.s32.totalorder %s132_s29, %s1059_s1 }
  0x48   : > { %p556_p3 = scmp.ne.s32.totalorder %s132_s29, %s555_s30  ;;  %p559_p7 = scmp.lt.s32.totalorder %s918_s4, %s555_s30 }
  0x4a   : > { %p560_p6 = por %p559_p7, %p558_p4 }
  0x4c   : > { %p561_p8 = pnand %p560_p6, %p556_p3 }
  0x4e   : > { %564 = shalt.err (!%p561_p8)  }
  0x4f   : > { %s565_s12 = scalar_lea.vmem %s910_s19, 16  ;;  %p570_p10 = scmp.lt.s32.totalorder %s910_s19, %s903_s10 }
  0x50   : > { %p566_p9 = scmp.ne.s32.totalorder %s910_s19, %s565_s12  ;;  %p571_p11 = scmp.lt.s32.totalorder %s927_s13, %s565_s12 }
  0x52   : > { %p572_p12 = por %p571_p11, %p570_p10 }
  0x54   : > { %p573_p13 = pnand %p572_p12, %p566_p9 }
  0x56   : > { %576 = shalt.err (!%p573_p13)  }
  0x57   : > { %145 = dma.hbm_to_vmem [thread:$0]  %s132_s29, 16, %s910_s19, [#allocation3 + $0x1] }
  0x58   : > { %s422_s27 = sshll.u32 %s908_s21, 4  ;;  %s163_s8 = sadd.s32 3, %s895_s6 }
  0x59   : > { %s149_s26 = scalar_lea.hbm %s1059_s1, %s422_s27  ;;  %s164_s28 = sld [smem:[#allocation5 + %s163_s8]] }
  0x5a   : > { %s577_s30 = scalar_lea.hbm %s149_s26, 16  ;;  %p580_p1 = scmp.lt.s32.totalorder %s149_s26, %s1059_s1 }
  0x5b   : > { %p578_p0 = scmp.ne.s32.totalorder %s149_s26, %s577_s30  ;;  %p581_p2 = scmp.lt.s32.totalorder %s918_s4, %s577_s30 }
  0x5d   : > { %p582_p3 = por %p581_p2, %p580_p1 }
  0x5f   : > { %p583_p4 = pnand %p582_p3, %p578_p0 }
  0x61   : > { %586 = shalt.err (!%p583_p4)  }
  0x62   : > { %s587_s19 = scalar_lea.vmem %s937_s22, 16  ;;  %p592_p6 = scmp.lt.s32.totalorder %s937_s22, %s903_s10 }
  0x63   : > { %p588_p7 = scmp.ne.s32.totalorder %s937_s22, %s587_s19  ;;  %p593_p8 = scmp.lt.s32.totalorder %s927_s13, %s587_s19 }
  0x65   : > { %p594_p9 = por %p593_p8, %p592_p6 }
  0x67   : > { %p595_p10 = pnand %p594_p9, %p588_p7 }
  0x69   : > { %598 = shalt.err (!%p595_p10)  }
  0x6a   : > { %162 = dma.hbm_to_vmem [thread:$0]  %s149_s26, 16, %s937_s22, [#allocation3 + $0x2] }
  0x6b   : > { %s180_s21 = sadd.s32 4, %s895_s6  ;;  %s798_s29 = smov [#allocation2 + $0x3]  }
  0x6c   : > { %s176_s12 = sshll.u32 %s798_s29, 4  ;;  %s181_s27 = sld [smem:[#allocation5 + %s180_s21]]  ;;  %s177_s12 = int_to_ptr.vmem [resolvable:$true] %s176_s12 }
  0x6d   : > { %s799_s8 = smov [#allocation2 + $0x4]   ;;  %s197_s0 = sadd.s32 5, %s895_s6 }
  0x6e   : > { %s193_s14 = sshll.u32 %s799_s8, 4  ;;  %s423_s30 = sshll.u32 %s164_s28, 4  ;;  %s966_s14 = int_to_ptr.vmem [resolvable:$true] %s193_s14 }
  0x6f   : > { %s166_s19 = scalar_lea.hbm %s1059_s1, %s423_s30  ;;  %s971_s5 = sld [smem:[#allocation5 + %s197_s0]] }
  0x70   : > { %s599_s2 = scalar_lea.hbm %s166_s19, 16  ;;  %p602_p12 = scmp.lt.s32.totalorder %s166_s19, %s1059_s1 }
  0x71   : > { %p600_p11 = scmp.ne.s32.totalorder %s166_s19, %s599_s2  ;;  %p603_p13 = scmp.lt.s32.totalorder %s918_s4, %s599_s2 }
  0x73   : > { %p604_p0 = por %p603_p13, %p602_p12 }
  0x75   : > { %p605_p1 = pnand %p604_p0, %p600_p11 }
  0x77   : > { %608 = shalt.err (!%p605_p1)  }
  0x78   : > { %s609_s21 = scalar_lea.vmem %s177_s12, 16  ;;  %p614_p3 = scmp.lt.s32.totalorder %s177_s12, %s903_s10 }
  0x79   : > { %p610_p2 = scmp.ne.s32.totalorder %s177_s12, %s609_s21  ;;  %p615_p4 = scmp.lt.s32.totalorder %s927_s13, %s609_s21 }
  0x7b   : > { %p616_p7 = por %p615_p4, %p614_p3 }
  0x7d   : > { %p617_p6 = pnand %p616_p7, %p610_p2 }
  0x7f   : > { %620 = shalt.err (!%p617_p6)  }
  0x80   : > { %179 = dma.hbm_to_vmem [thread:$0]  %s166_s19, 16, %s177_s12, [#allocation3 + $0x3] }
  0x81   : > { %s424_s28 = sshll.u32 %s181_s27, 4  ;;  %s800_s2 = smov [#allocation2 + $0x5]  }
  0x82   : > { %s183_s0 = scalar_lea.hbm %s1059_s1, %s424_s28  ;;  %s210_s30 = sshll.u32 %s800_s2, 4  ;;  %s211_s30 = int_to_ptr.vmem [resolvable:$true] %s210_s30 }
  0x83   : > { %s621_s9 = scalar_lea.hbm %s183_s0, 16  ;;  %p624_p9 = scmp.lt.s32.totalorder %s183_s0, %s1059_s1 }
  0x84   : > { %p622_p8 = scmp.ne.s32.totalorder %s183_s0, %s621_s9  ;;  %p625_p10 = scmp.lt.s32.totalorder %s918_s4, %s621_s9 }
  0x86   : > { %p626_p11 = por %p625_p10, %p624_p9 }
  0x88   : > { %p627_p12 = pnand %p626_p11, %p622_p8 }
  0x8a   : > { %630 = shalt.err (!%p627_p12)  }
  0x8b   : > { %s631_s12 = scalar_lea.vmem %s966_s14, 16  ;;  %p636_p0 = scmp.lt.s32.totalorder %s966_s14, %s903_s10 }
  0x8c   : > { %p632_p13 = scmp.ne.s32.totalorder %s966_s14, %s631_s12  ;;  %p637_p1 = scmp.lt.s32.totalorder %s927_s13, %s631_s12 }
  0x8e   : > { %p638_p2 = por %p637_p1, %p636_p0 }
  0x90   : > { %p639_p3 = pnand %p638_p2, %p632_p13 }
  0x92   : > { %642 = shalt.err (!%p639_p3)  }
  0x93   : > { %196 = dma.hbm_to_vmem [thread:$0]  %s183_s0, 16, %s966_s14, [#allocation3 + $0x4] }
  0x94   : > { %s214_s27 = sadd.s32 6, %s895_s6  ;;  %s425_s19 = sshll.u32 %s971_s5, 4 }
  0x95   : > { %s215_s26 = sld [smem:[#allocation5 + %s214_s27]]  ;;  %s200_s29 = scalar_lea.hbm %s1059_s1, %s425_s19 }
  0x96   : > { %s643_s8 = scalar_lea.hbm %s200_s29, 16  ;;  %p646_p7 = scmp.lt.s32.totalorder %s200_s29, %s1059_s1 }
  0x97   : > { %p644_p4 = scmp.ne.s32.totalorder %s200_s29, %s643_s8  ;;  %p647_p6 = scmp.lt.s32.totalorder %s918_s4, %s643_s8 }
  0x99   : > { %p648_p8 = por %p647_p6, %p646_p7 }
  0x9b   : > { %p649_p9 = pnand %p648_p8, %p644_p4 }
  0x9d   : > { %652 = shalt.err (!%p649_p9)  }
  0x9e   : > { %s653_s11 = scalar_lea.vmem %s211_s30, 16  ;;  %p658_p11 = scmp.lt.s32.totalorder %s211_s30, %s903_s10 }
  0x9f   : > { %p654_p10 = scmp.ne.s32.totalorder %s211_s30, %s653_s11  ;;  %p659_p12 = scmp.lt.s32.totalorder %s927_s13, %s653_s11 }
  0xa1   : > { %p660_p13 = por %p659_p12, %p658_p11 }
  0xa3   : > { %p661_p0 = pnand %p660_p13, %p654_p10 }
  0xa5   : > { %664 = shalt.err (!%p661_p0)  }
  0xa6   : > { %213 = dma.hbm_to_vmem [thread:$0]  %s200_s29, 16, %s211_s30, [#allocation3 + $0x5] }
  0xa7   : > { %s801_s5 = smov [#allocation2 + $0x6]   ;;  %s231_s0 = sadd.s32 7, %s895_s6 }
  0xa8   : > { %s227_s14 = sshll.u32 %s801_s5, 4  ;;  %s232_s22 = sld [smem:[#allocation5 + %s231_s0]]  ;;  %s228_s14 = int_to_ptr.vmem [resolvable:$true] %s227_s14 }
  0xa9   : > { %s426_s12 = sshll.u32 %s215_s26, 4  ;;  %s802_s27 = smov [#allocation2 + $0x7]  }
  0xaa   : > { %s244_s19 = sshll.u32 %s802_s27, 4  ;;  %s217_s8 = scalar_lea.hbm %s1059_s1, %s426_s12  ;;  %s245_s19 = int_to_ptr.vmem [resolvable:$true] %s244_s19 }
  0xab   : > { %s665_s2 = scalar_lea.hbm %s217_s8, 16  ;;  %p668_p2 = scmp.lt.s32.totalorder %s217_s8, %s1059_s1 }
  0xac   : > { %p666_p1 = scmp.ne.s32.totalorder %s217_s8, %s665_s2  ;;  %p669_p3 = scmp.lt.s32.totalorder %s918_s4, %s665_s2 }
  0xae   : > { %p670_p4 = por %p669_p3, %p668_p2 }
  0xb0   : > { %p671_p7 = pnand %p670_p4, %p666_p1 }
  0xb2   : > { %674 = shalt.err (!%p671_p7)  }
  0xb3   : > { %s675_s30 = scalar_lea.vmem %s228_s14, 16  ;;  %p680_p8 = scmp.lt.s32.totalorder %s228_s14, %s903_s10 }
  0xb4   : > { %p676_p6 = scmp.ne.s32.totalorder %s228_s14, %s675_s30  ;;  %p681_p9 = scmp.lt.s32.totalorder %s927_s13, %s675_s30 }
  0xb6   : > { %p682_p10 = por %p681_p9, %p680_p8 }
  0xb8   : > { %p683_p11 = pnand %p682_p10, %p676_p6 }
  0xba   : > { %686 = shalt.err (!%p683_p11)  }
  0xbb   : > { %230 = dma.hbm_to_vmem [thread:$0]  %s217_s8, 16, %s228_s14, [#allocation3 + $0x6] }
  0xbc   : > { %s427_s26 = sshll.u32 %s232_s22, 4 }
  0xbd   : > { %s234_s0 = scalar_lea.hbm %s1059_s1, %s427_s26 }
  0xbe   : > { %s687_s12 = scalar_lea.hbm %s234_s0, 16  ;;  %p690_p13 = scmp.lt.s32.totalorder %s234_s0, %s1059_s1 }
  0xbf   : > { %p688_p12 = scmp.ne.s32.totalorder %s234_s0, %s687_s12  ;;  %p691_p0 = scmp.lt.s32.totalorder %s918_s4, %s687_s12 }
  0xc1   : > { %p692_p1 = por %p691_p0, %p690_p13 }
  0xc3   : > { %p693_p2 = pnand %p692_p1, %p688_p12 }
  0xc5   : > { %696 = shalt.err (!%p693_p2)  }
  0xc6   : > { %s697_s28 = scalar_lea.vmem %s245_s19, 16  ;;  %p702_p4 = scmp.lt.s32.totalorder %s245_s19, %s903_s10 }
  0xc7   : > { %p698_p3 = scmp.ne.s32.totalorder %s245_s19, %s697_s28  ;;  %p703_p7 = scmp.lt.s32.totalorder %s927_s13, %s697_s28 }
  0xc9   : > { %p704_p6 = por %p703_p7, %p702_p4 }
  0xcb   : > { %p705_p8 = pnand %p704_p6, %p698_p3 }
  0xcd   : > { %708 = shalt.err (!%p705_p8)  }
  0xce   : > { %247 = dma.hbm_to_vmem [thread:$0]  %s234_s0, 16, %s245_s19, [#allocation3 + $0x7] }
  0xcf   : > { %s113_s14 = scalar_lea.vmem [#allocation9], %s899_s7 }
  0xd0   : > { %757 = dma.done.wait [#allocation3], 16 }
  0xd1   : > { %758 = vsyncadd [#allocation3], 4294967280 }
  0xd2   : > { %759 = dma.done.wait [#allocation3 + $0x1], 16 }
  0xd3   : > { %760 = vsyncadd [#allocation3 + $0x1], 4294967280 }
  0xd4   : > { %761 = dma.done.wait [#allocation3 + $0x2], 16 }
  0xd5   : > { %762 = vsyncadd [#allocation3 + $0x2], 4294967280 }
  0xd6   : > { %763 = dma.done.wait [#allocation3 + $0x3], 16 }
  0xd7   : > { %764 = vsyncadd [#allocation3 + $0x3], 4294967280 }
  0xd8   : > { %765 = dma.done.wait [#allocation3 + $0x4], 16 }
  0xd9   : > { %766 = vsyncadd [#allocation3 + $0x4], 4294967280 }
  0xda   : > { %767 = dma.done.wait [#allocation3 + $0x5], 16 }
  0xdb   : > { %768 = vsyncadd [#allocation3 + $0x5], 4294967280 }
  0xdc   : > { %769 = dma.done.wait [#allocation3 + $0x6], 16 }
  0xdd   : > { %770 = vsyncadd [#allocation3 + $0x6], 4294967280 }
  0xde   : > { %771 = dma.done.wait [#allocation3 + $0x7], 16 }
  0xdf   : > { %772 = vsyncadd [#allocation3 + $0x7], 4294967280  ;;  %s283_s7 = sshll.u32 %s113_s14, 4  ;;  %v265_v0 = vld [vmem:[#allocation2] sm:$0xff]  ;;  %v266_v1 = vld [vmem:[#allocation6] sm:$0xff]  ;;  %s281_s13 = scalar_lea.hbm %s1061_s3, %s895_s6  ;;  %s284_s7 = int_to_ptr.vmem [resolvable:$true] %s283_s7 }
  0xe0   : > { %v267_v2 = vadd.f32 %v266_v1, %v265_v0  ;;  %s1068_s22 = sand.u32 1, %s783_s16   ;;  %s709_s8 = scalar_lea.vmem %s284_s7, 128 }
  0xe1   : > { %s270_s19 = scalar_lea.sflag [#allocation8], %s1068_s22  ;;  %p710_p9 = scmp.ne.s32.totalorder %s284_s7, %s709_s8 }
  0xe2   : > { %268 = vst [vmem:[%s113_s14] sm:$0xff] %v267_v2  ;;  %s803_s2 = smov [#allocation9]  }
  0xe3   : > { %p711_p10 = pnand %p710_p9, %p865_p5  ;;  %s713_s9 = sshll.u32 %s803_s2, 4  ;;  %s714_s9 = int_to_ptr.vmem [resolvable:$false] %s713_s9 }
  0xe4   : > { %s715_s11 = scalar_lea.vmem %s714_s9, 256  ;;  %p716_p12 = scmp.lt.s32.totalorder %s284_s7, %s714_s9 }
  0xe5   : > { %p712_p11 = pneg %p711_p10  ;;  %p717_p13 = scmp.lt.s32.totalorder %s715_s11, %s709_s8 }
  0xe7   : > { %p718_p0 = por %p717_p13, %p716_p12 }
  0xe9   : > { %p719_p1 = pnand %p718_p0, %p712_p11 }
  0xeb   : > { %722 = shalt.err (!%p719_p1)
}
  0xec   : > { %s723_s30 = scalar_lea.hbm %s281_s13, 128  ;;  %s727_s29 = scalar_lea.hbm %s1061_s3, 256 }
  0xed   : > { %p724_p2 = scmp.ne.s32.totalorder %s281_s13, %s723_s30  ;;  %p728_p7 = scmp.lt.s32.totalorder %s281_s13, %s1061_s3 }
  0xee   : > { %p729_p6 = scmp.lt.s32.totalorder %s727_s29, %s723_s30 }
  0xef   : > { %p725_p3 = pnand %p724_p2, %p865_p5 }
  0xf0   : > { %p730_p8 = por %p729_p6, %p728_p7 }
  0xf1   : > { %p726_p4 = pneg %p725_p3 }
  0xf3   : > { %p731_p9 = pnand %p730_p8, %p726_p4 }
  0xf5   : > { %734 = shalt.err (!%p731_p9)
}
  0xf6   : > { %444 = dma.vmem_to_hbm [thread:$0]  (%p865_p5), %s284_s7, 128, %s281_s13, %s270_s19  }
  0xf7 PF: > { %p456_p10 = scmp.ge.s32.totalorder %s791_s18, 2  ;;  %s295_s12 = sand.u32 1, %s779_s15  }
  0xf8   : > { %p1069_p11 = scmp.ne.s32.totalorder %s1065_s25, 0  ;;  %s296_s27 = scalar_lea.sflag [#allocation8], %s295_s12 }
  0xfa   : > { %p451_p12 = pnand %p456_p10, %p1069_p11 }
  0xfc   : > { %p452_p13 = pneg %p451_p12 }
  0xfe   : > { %774 = dma.done.wait (%p452_p13), %s296_s27, 128  }
  0xff   : > { %776 = vsyncadd (%p452_p13), %s296_s27, 4294967168  ;;  %p18_p0 = scmp.ge.s32.totalorder %s852_s20, 4   ;;  %s1070_s15 = smov %s783_s16 }
 0x100   : > { %s1071_s16 = smov %s787_s17  ;;  %s1072_s17 = smov %s863_s23 }
 0x101   : > { %s1073_s18 = smov %s852_s20  ;;  %20 = sbr.rel (!%p18_p0) target bundleno = 10 (0xa), region = 122 }
 0x106   :  { %301 = vsyncpa [#allocation7], 1 }
 0x107   :  { %303 = vsyncpa [#allocation7 + $0x1], 1 }
 0x108   :  { %304 = vsyncpa [#allocation8], 1 }
 0x109   :  { %306 = vsyncpa [#allocation8 + $0x1], 1 }
 0x10a   :  { %307 = vsyncmov [#allocation3] }
 0x10d   :  { %s308_s18 = vpop.sfrf %307 }
 0x10e   :  { %p432_p5 = scmp.ne.s32.totalorder %s308_s18, 0 }
 0x110   :  { %312 = shalt.err (%p432_p5)  }
 0x111   :  { %314 = vsyncmov [#allocation3 + $0x1] }
 0x114   :  { %s315_s24 = vpop.sfrf %314 }
 0x115   :  { %p433_p1 = scmp.ne.s32.totalorder %s315_s24, 0 }
 0x117   :  { %319 = shalt.err (%p433_p1)  }
 0x118   :  { %321 = vsyncmov [#allocation3 + $0x2] }
 0x11b   :  { %s322_s25 = vpop.sfrf %321 }
 0x11c   :  { %p434_p2 = scmp.ne.s32.totalorder %s322_s25, 0 }
 0x11e   :  { %326 = shalt.err (%p434_p2)  }
 0x11f   :  { %328 = vsyncmov [#allocation3 + $0x3] }
 0x122   :  { %s329_s23 = vpop.sfrf %328 }
 0x123   :  { %p435_p3 = scmp.ne.s32.totalorder %s329_s23, 0 }
 0x125   :  { %333 = shalt.err (%p435_p3)  }
 0x126   :  { %335 = vsyncmov [#allocation3 + $0x4] }
 0x129   :  { %s336_s1 = vpop.sfrf %335 }
 0x12a   :  { %p436_p4 = scmp.ne.s32.totalorder %s336_s1, 0 }
 0x12c   :  { %340 = shalt.err (%p436_p4)  }
 0x12d   :  { %342 = vsyncmov [#allocation3 + $0x5] }
 0x130   :  { %s343_s3 = vpop.sfrf %342 }
 0x131   :  { %p437_p7 = scmp.ne.s32.totalorder %s343_s3, 0 }
 0x133   :  { %347 = shalt.err (%p437_p7)  }
 0x134   :  { %349 = vsyncmov [#allocation3 + $0x6] }
 0x137   :  { %s350_s15 = vpop.sfrf %349 }
 0x138   :  { %p438_p6 = scmp.ne.s32.totalorder %s350_s15, 0 }
 0x13a   :  { %354 = shalt.err (%p438_p6)  }
 0x13b   :  { %356 = vsyncmov [#allocation3 + $0x7] }
 0x13e   :  { %s357_s16 = vpop.sfrf %356 }
 0x13f   :  { %p439_p8 = scmp.ne.s32.totalorder %s357_s16, 0 }
 0x141   :  { %361 = shalt.err (%p439_p8)  }

</bundles_post_ra>
